<compile_context>
chip_gen: v7x
topology: tpu7x:2x2x1
jax: 0.10.0
libtpu: 0.0.40
codegen_flags: <defaults>
</compile_context>

<pallas_src>
import functools

import jax
import jax.numpy as jnp
from jax.experimental import pallas as pl
from jax.experimental.pallas import tpu as pltpu

_NEG = float("-inf")


def _round_up(a, b):
    return (a + b - 1) // b * b


def _vmem_capacity_bytes():
    """Per-core VMEM capacity (v5e/v6e: 128 MiB, v7x: 64 MiB), with fallback."""
    try:
        info = pltpu.get_tpu_info()
        cap = getattr(info, "vmem_capacity_bytes", None)
        if cap:
            return int(cap)
    except Exception:
        pass
    return 64 * 1024 * 1024  # conservative (v7x per-core VMEM)


def _accum_chunks_loop(x_ref, acc_s, acc_m, n_chunks):
    """Accumulate n_chunks full 128-lane chunks of x_ref into (C,128) sum/max."""
    if n_chunks <= 0:
        return acc_s, acc_m

    def body(j, carry):
        s, m = carry
        base = pl.multiple_of(j * 128, 128)
        chunk = x_ref[:, pl.ds(base, 128)].astype(jnp.float32)
        return s + chunk, jnp.maximum(m, chunk)

    unroll = n_chunks if n_chunks <= 8 else None
    return jax.lax.fori_loop(0, n_chunks, body, (acc_s, acc_m), unroll=unroll)


def _fc_gate(w1_ref, w2_ref, avg, mx):
    """sigmoid(fc(avg) + fc(max)) for (C,1) pooled columns (two tiny matmuls)."""
    h_a = jnp.maximum(
        jnp.dot(w1_ref[...], avg, preferred_element_type=jnp.float32), 0.0)
    h_m = jnp.maximum(
        jnp.dot(w1_ref[...], mx, preferred_element_type=jnp.float32), 0.0)
    g = (jnp.dot(w2_ref[...], h_a, preferred_element_type=jnp.float32)
         + jnp.dot(w2_ref[...], h_m, preferred_element_type=jnp.float32))
    return jax.nn.sigmoid(g)                                   # (C, 1) f32


# ----------------------------------------------------------------------------
# Single-pass kernel: whole (C, HW) tile per batch element.
# ----------------------------------------------------------------------------
def _ca_fused_kernel(x_ref, w1_ref, w2_ref, o_ref, *, hw):
    C = x_ref.shape[0]
    n_full = hw // 128
    rem = hw - n_full * 128

    # Pooling: chunked VALU accumulation into (C,128); single XLU reduce after.
    acc_s = jnp.zeros((C, 128), jnp.float32)
    acc_m = jnp.full((C, 128), _NEG, jnp.float32)
    acc_s, acc_m = _accum_chunks_loop(x_ref, acc_s, acc_m, n_full)
    s = jnp.sum(acc_s, axis=-1, keepdims=True)                 # (C, 1)
    m = jnp.max(acc_m, axis=-1, keepdims=True)                 # (C, 1)
    if rem:
        tail = x_ref[:, pl.ds(n_full * 128, rem)].astype(jnp.float32)  # (C, rem)
        s = s + jnp.sum(tail, axis=-1, keepdims=True)
        m = jnp.maximum(m, jnp.max(tail, axis=-1, keepdims=True))
    avg = s * (1.0 / hw)

    gate = _fc_gate(w1_ref, w2_ref, avg, m)                    # (C, 1) f32
    if o_ref.dtype != jnp.float32:
        # Native low-precision gating (bf16 VALU on v6e/v7x; v5e upcasts itself).
        gate = gate.astype(o_ref.dtype)

    # Gated store in 128-lane chunks: tile re-read from VMEM, bounded live range.
    if n_full:
        @pl.loop(0, n_full)
        def _(j):
            base = pl.multiple_of(j * 128, 128)
            o_ref[:, pl.ds(base, 128)] = x_ref[:, pl.ds(base, 128)] * gate
    if rem:
        o_ref[:, pl.ds(n_full * 128, rem)] = x_ref[:, pl.ds(n_full * 128, rem)] * gate


def _ca_single_pass(xf, w1, w2, hw, vmem_limit):
    B, C, _ = xf.shape
    hidden = w1.shape[0]
    kernel = functools.partial(_ca_fused_kernel, hw=hw)
    return pl.pallas_call(
        kernel,
        out_shape=jax.ShapeDtypeStruct((B, C, hw), xf.dtype),
        grid_spec=pltpu.PrefetchScalarGridSpec(
            num_scalar_prefetch=0,
            grid=(B,),
            in_specs=[
                # Block last dim == full array dim (legal even if not 128-aligned).
                pl.BlockSpec((pl.Squeezed(), C, hw), lambda b: (b, 0, 0)),
                pl.BlockSpec((hidden, C), lambda b: (0, 0)),
                pl.BlockSpec((C, hidden), lambda b: (0, 0)),
            ],
            out_specs=pl.BlockSpec((pl.Squeezed(), C, hw), lambda b: (b, 0, 0)),
        ),
        compiler_params=pltpu.CompilerParams(
            dimension_semantics=("parallel",),
            vmem_limit_bytes=vmem_limit,
        ),
    )(xf, w1, w2)


# ----------------------------------------------------------------------------
# Two-phase path: (1) lane-tiled pooling + gate, (2) elementwise gate-apply.
# ----------------------------------------------------------------------------
def _ca_pool_gate_kernel(x_ref, w1_ref, w2_ref, gate_ref, sum_acc, max_acc,
                         *, hw, lane_tile, num_t):
    t = pl.program_id(1)
    n_chunks = lane_tile // 128

    @pl.when(t == 0)
    def _init():
        sum_acc[...] = jnp.zeros_like(sum_acc)
        max_acc[...] = jnp.full_like(max_acc, _NEG)

    def _accum_full():
        acc_s, acc_m = _accum_chunks_loop(x_ref, sum_acc[...], max_acc[...], n_chunks)
        sum_acc[...] = acc_s
        max_acc[...] = acc_m

    def _accum_tail():
        # Last (partial) tile: mask only the straddling 128-lane chunk; chunks
        # fully past `hw` are skipped entirely (all bounds static here).
        base0 = (num_t - 1) * lane_tile
        valid = hw - base0                     # in (0, lane_tile)
        n_full = valid // 128
        rem = valid - n_full * 128
        acc_s, acc_m = _accum_chunks_loop(x_ref, sum_acc[...], max_acc[...], n_full)
        if rem:
            chunk = x_ref[:, pl.ds(n_full * 128, 128)].astype(jnp.float32)
            lane = jax.lax.broadcasted_iota(jnp.int32, chunk.shape, 1)
            ok = lane < rem
            acc_s = acc_s + jnp.where(ok, chunk, 0.0)
            acc_m = jnp.maximum(acc_m, jnp.where(ok, chunk, _NEG))
        sum_acc[...] = acc_s
        max_acc[...] = acc_m

    tail_exists = (hw % lane_tile) != 0        # static
    if tail_exists:
        @pl.when(t != num_t - 1)
        def _():
            _accum_full()

        @pl.when(t == num_t - 1)
        def _():
            _accum_tail()
    else:
        _accum_full()

    @pl.when(t == num_t - 1)
    def _finalize():
        avg = jnp.sum(sum_acc[...], axis=-1, keepdims=True) * (1.0 / hw)
        mx = jnp.max(max_acc[...], axis=-1, keepdims=True)
        gate_ref[...] = _fc_gate(w1_ref, w2_ref, avg, mx).astype(gate_ref.dtype)


def _ca_apply_kernel(x_ref, gate_ref, o_ref):
    gate = gate_ref[...]                                        # (C, 1) f32
    if o_ref.dtype == jnp.float32:
        o_ref[...] = x_ref[...] * gate
    else:
        # Native bf16 multiply (halves vreg / VMEM traffic on v6e/v7x).
        o_ref[...] = (x_ref[...] * gate.astype(o_ref.dtype)).astype(o_ref.dtype)


def _ca_two_phase(xf, w1, w2, hw, lane_tile, num_t, vmem_limit):
    B, C, _ = xf.shape
    hidden = w1.shape[0]

    pool_kernel = functools.partial(
        _ca_pool_gate_kernel, hw=hw, lane_tile=lane_tile, num_t=num_t)

    gate = pl.pallas_call(
        pool_kernel,
        out_shape=jax.ShapeDtypeStruct((B, C, 1), jnp.float32),
        grid_spec=pltpu.PrefetchScalarGridSpec(
            num_scalar_prefetch=0,
            grid=(B, num_t),
            in_specs=[
                pl.BlockSpec((pl.Squeezed(), C, lane_tile), lambda b, t: (b, 0, t)),
                pl.BlockSpec((hidden, C), lambda b, t: (0, 0)),
                pl.BlockSpec((C, hidden), lambda b, t: (0, 0)),
            ],
            out_specs=pl.BlockSpec((pl.Squeezed(), C, 1), lambda b, t: (b, 0, 0)),
            scratch_shapes=[
                pltpu.VMEM((C, 128), jnp.float32),   # wide running sum
                pltpu.VMEM((C, 128), jnp.float32),   # wide running max
            ],
        ),
        compiler_params=pltpu.CompilerParams(
            dimension_semantics=("parallel", "arbitrary"),
            vmem_limit_bytes=vmem_limit,
        ),
    )(xf, w1, w2)

    out = pl.pallas_call(
        _ca_apply_kernel,
        out_shape=jax.ShapeDtypeStruct((B, C, hw), xf.dtype),
        grid_spec=pltpu.PrefetchScalarGridSpec(
            num_scalar_prefetch=0,
            grid=(B, num_t),
            in_specs=[
                pl.BlockSpec((pl.Squeezed(), C, lane_tile), lambda b, t: (b, 0, t)),
                pl.BlockSpec((pl.Squeezed(), C, 1), lambda b, t: (b, 0, 0)),
            ],
            out_specs=pl.BlockSpec((pl.Squeezed(), C, lane_tile), lambda b, t: (b, 0, t)),
        ),
        compiler_params=pltpu.CompilerParams(
            dimension_semantics=("parallel", "parallel"),
            vmem_limit_bytes=vmem_limit,
        ),
    )(xf, gate)
    return out


# ----------------------------------------------------------------------------
# Public wrapper
# ----------------------------------------------------------------------------
def channel_attention(x, w1, w2, *, target_tile_bytes=2 * 1024 * 1024,
                      lane_tile=None, max_single_block_bytes=None):
    """ChannelAttention forward.  x: (B, C, H, W); w1: (C//r, C); w2: (C, C//r)."""
    B, C, H, W = x.shape
    hw = H * W
    itemsize = jnp.dtype(x.dtype).itemsize
    hw_pad128 = _round_up(hw, 128)

    # Generation-aware VMEM budget: single-pass needs ~4x the block
    # (in + out, each double-buffered) plus headroom for internal scratch.
    vmem_cap = _vmem_capacity_bytes()
    vmem_limit = max(min(int(vmem_cap * 0.85), vmem_cap - 8 * 1024 * 1024),
                     16 * 1024 * 1024)
    if max_single_block_bytes is None:
        max_single_block_bytes = (vmem_limit - 2 * 1024 * 1024) // 4

    # Two-phase lane tile: target >= ~target_tile_bytes per block so DMAs are
    # long and per-grid-step overhead is amortized (decoupled from small C).
    if lane_tile is None:
        lane_tile = _round_up(max(target_tile_bytes // (C * itemsize), 128), 128)
    else:
        lane_tile = max(128, _round_up(lane_tile, 128))
    lane_tile = min(lane_tile, hw_pad128)
    num_t = pl.cdiv(hw, lane_tile)

    single_block_bytes = C * hw_pad128 * itemsize
    use_single = single_block_bytes <= max_single_block_bytes
    # A 1-step grid has no pipelining (and uses only one of v7x's two cores);
    # prefer the tiled two-phase path when B == 1 but there are multiple tiles.
    if B == 1 and num_t >= 2:
        use_single = False

    xf = x.reshape(B, C, hw)        # pure view change; no pad / no extra copy
    if use_single:
        out = _ca_single_pass(xf, w1, w2, hw, vmem_limit)
    else:
        out = _ca_two_phase(xf, w1, w2, hw, lane_tile, num_t, vmem_limit)
    return out.reshape(B, C, H, W)


def channel_attention_ref(x, w1, w2):
    """Pure-JAX reference matching the PyTorch forward pass (computed in f32)."""
    xf = x.astype(jnp.float32)
    avg = jnp.mean(xf, axis=(2, 3))                             # (B, C)
    mx = jnp.max(xf, axis=(2, 3))                               # (B, C)

    def fc(v):
        return jnp.maximum(v @ w1.T, 0.0) @ w2.T

    gate = jax.nn.sigmoid(fc(avg) + fc(mx))                     # (B, C)
    return xf * gate[:, :, None, None]


def _run_case(key, B, C, H, W, reduction_ratio=16, all_negative=False,
              dtype=jnp.float32, rtol=1e-5, atol=1e-5, **kwargs):
    hidden = max(C // reduction_ratio, 1)
    kx, k1, k2 = jax.random.split(key, 3)
    x = jax.random.normal(kx, (B, C, H, W), dtype=jnp.float32)
    if all_negative:
        x = -jnp.abs(x) - 0.1      # stresses max-pool masking of ragged lanes
    x = x.astype(dtype)
    w1 = jax.random.normal(k1, (hidden, C), dtype=jnp.float32) * 0.1
    w2 = jax.random.normal(k2, (C, hidden), dtype=jnp.float32) * 0.1

    out = jax.block_until_ready(channel_attention(x, w1, w2, **kwargs))
    ref = channel_attention_ref(x, w1, w2)
    assert out.shape == x.shape and out.dtype == x.dtype
    assert jnp.allclose(out.astype(jnp.float32), ref, rtol=rtol, atol=atol), \
        f"mismatch vs reference for case {(B, C, H, W, dtype)} {kwargs}"


if __name__ == "__main__":
    keys = jax.random.split(jax.random.PRNGKey(0), 5)

    # 1) Lane-aligned HW = 256, f32 -> single-pass fused kernel.
    _run_case(keys[0], B=2, C=32, H=16, W=16)

    # 2) Ragged HW = 196 with all-negative input -> single-pass, masked tail
    #    chunk for both sum and max (no wrapper-side pad / slice).
    _run_case(keys[1], B=2, C=32, H=14, W=14, all_negative=True)

    # 3) Forced two-phase path: multi-tile reduction across grid steps with a
    #    masked ragged last tile.
    _run_case(keys[2], B=2, C=32, H=14, W=14, all_negative=True,
              lane_tile=128, max_single_block_bytes=0)

    # 4) B = 1 is rerouted to the tiled two-phase path (pipelining / megacore).
    _run_case(keys[3], B=1, C=32, H=32, W=32, lane_tile=256)

    # 5) bf16 input -> native bf16 gate-apply store path.
    _run_case(keys[4], B=2, C=32, H=16, W=16, dtype=jnp.bfloat16,
              rtol=2e-2, atol=2e-2)

    print("KERNEL_OK")
</pallas_src>

<mosaic_0001>
module attributes {stable_mosaic.version = 11 : i64} {
  func.func @_ca_fused_kernel(%arg0: i32, %arg1: memref<1x32x256xf32, #tpu.memory_space<vmem>>, %arg2: memref<2x32xf32, #tpu.memory_space<vmem>>, %arg3: memref<32x2xf32, #tpu.memory_space<vmem>>, %arg4: memref<1x32x256xf32, #tpu.memory_space<vmem>>) attributes {dimension_semantics = [#tpu.dimension_semantics<parallel>], iteration_bounds = array<i64: 2>, scalar_prefetch = 0 : i64, scratch_operands = 0 : i64, tpu.core_type = #tpu.core_type<tc>, window_params = [{transform_indices = @transform_0, window_bounds = array<i64: 1, 32, 256>}, {pipeline_mode = #tpu.pipeline_mode<synchronous>, transform_indices = @transform_1, window_bounds = array<i64: 2, 32>}, {pipeline_mode = #tpu.pipeline_mode<synchronous>, transform_indices = @transform_2, window_bounds = array<i64: 32, 2>}, {transform_indices = @transform_3, window_bounds = array<i64: 1, 32, 256>}]} {
    %cst = arith.constant 0.000000e+00 : f32
    %0 = vector.broadcast %cst : f32 to vector<32x128xf32>
    %cst_0 = arith.constant 0xFF800000 : f32
    %1 = vector.broadcast %cst_0 : f32 to vector<32x128xf32>
    %c0_i32 = arith.constant 0 : i32
    %c128_i32 = arith.constant 128 : i32
    %2 = arith.muli %c0_i32, %c128_i32 : i32
    %3 = tpu.assume_multiple %2, 128 : i32
    %c0 = arith.constant 0 : index
    %c0_1 = arith.constant 0 : index
    %4 = arith.index_cast %3 : i32 to index
    %5 = vector.load %arg1[%c0, %c0_1, %4] : memref<1x32x256xf32, #tpu.memory_space<vmem>>, vector<1x32x128xf32>
    %6 = vector.shape_cast %5 : vector<1x32x128xf32> to vector<32x128xf32>
    %7 = arith.addf %0, %6 : vector<32x128xf32>
    %8 = arith.maximumf %1, %6 : vector<32x128xf32>
    %c1_i32 = arith.constant 1 : i32
    %c128_i32_2 = arith.constant 128 : i32
    %9 = arith.muli %c1_i32, %c128_i32_2 : i32
    %10 = tpu.assume_multiple %9, 128 : i32
    %c0_3 = arith.constant 0 : index
    %c0_4 = arith.constant 0 : index
    %11 = arith.index_cast %10 : i32 to index
    %12 = vector.load %arg1[%c0_3, %c0_4, %11] : memref<1x32x256xf32, #tpu.memory_space<vmem>>, vector<1x32x128xf32>
    %13 = vector.shape_cast %12 : vector<1x32x128xf32> to vector<32x128xf32>
    %14 = arith.addf %7, %13 : vector<32x128xf32>
    %15 = arith.maximumf %8, %13 : vector<32x128xf32>
    %c2_i32 = arith.constant 2 : i32
    %cst_5 = arith.constant dense<0.000000e+00> : vector<32xf32>
    %16 = vector.multi_reduction <add>, %14, %cst_5 [1] : vector<32x128xf32> to vector<32xf32>
    %17 = vector.shape_cast %16 : vector<32xf32> to vector<32x1xf32>
    %cst_6 = arith.constant dense<0xFF800000> : vector<32xf32>
    %18 = vector.multi_reduction <maximumf>, %15, %cst_6 [1] : vector<32x128xf32> to vector<32xf32>
    %19 = vector.shape_cast %18 : vector<32xf32> to vector<32x1xf32>
    %cst_7 = arith.constant 3.906250e-03 : f32
    %20 = vector.broadcast %cst_7 : f32 to vector<32x1xf32>
    %21 = arith.mulf %17, %20 : vector<32x1xf32>
    %c0_8 = arith.constant 0 : index
    %c0_9 = arith.constant 0 : index
    %22 = vector.load %arg2[%c0_8, %c0_9] : memref<2x32xf32, #tpu.memory_space<vmem>>, vector<2x32xf32>
    %cst_10 = arith.constant dense<0.000000e+00> : vector<2x1xf32>
    %23 = tpu.matmul %22, %21, %cst_10 {dimension_numbers = #tpu.dot_dimension_numbers<[1], [0], [0], [1], [0, 0, 1, 1], [], []>} : vector<2x32xf32>, vector<32x1xf32>, vector<2x1xf32> -> vector<2x1xf32>
    %cst_11 = arith.constant 0.000000e+00 : f32
    %24 = vector.broadcast %cst_11 : f32 to vector<2x1xf32>
    %25 = arith.maximumf %23, %24 : vector<2x1xf32>
    %c0_12 = arith.constant 0 : index
    %c0_13 = arith.constant 0 : index
    %26 = vector.load %arg2[%c0_12, %c0_13] : memref<2x32xf32, #tpu.memory_space<vmem>>, vector<2x32xf32>
    %cst_14 = arith.constant dense<0.000000e+00> : vector<2x1xf32>
    %27 = tpu.matmul %26, %19, %cst_14 {dimension_numbers = #tpu.dot_dimension_numbers<[1], [0], [0], [1], [0, 0, 1, 1], [], []>} : vector<2x32xf32>, vector<32x1xf32>, vector<2x1xf32> -> vector<2x1xf32>
    %cst_15 = arith.constant 0.000000e+00 : f32
    %28 = vector.broadcast %cst_15 : f32 to vector<2x1xf32>
    %29 = arith.maximumf %27, %28 : vector<2x1xf32>
    %c0_16 = arith.constant 0 : index
    %c0_17 = arith.constant 0 : index
    %30 = vector.load %arg3[%c0_16, %c0_17] : memref<32x2xf32, #tpu.memory_space<vmem>>, vector<32x2xf32>
    %cst_18 = arith.constant dense<0.000000e+00> : vector<32x1xf32>
    %31 = tpu.matmul %30, %25, %cst_18 {dimension_numbers = #tpu.dot_dimension_numbers<[1], [0], [0], [1], [0, 0, 1, 1], [], []>} : vector<32x2xf32>, vector<2x1xf32>, vector<32x1xf32> -> vector<32x1xf32>
    %c0_19 = arith.constant 0 : index
    %c0_20 = arith.constant 0 : index
    %32 = vector.load %arg3[%c0_19, %c0_20] : memref<32x2xf32, #tpu.memory_space<vmem>>, vector<32x2xf32>
    %cst_21 = arith.constant dense<0.000000e+00> : vector<32x1xf32>
    %33 = tpu.matmul %32, %29, %cst_21 {dimension_numbers = #tpu.dot_dimension_numbers<[1], [0], [0], [1], [0, 0, 1, 1], [], []>} : vector<32x2xf32>, vector<2x1xf32>, vector<32x1xf32> -> vector<32x1xf32>
    %34 = arith.addf %31, %33 : vector<32x1xf32>
    %35 = arith.negf %34 : vector<32x1xf32>
    %36 = math.exp %35 : vector<32x1xf32>
    %cst_22 = arith.constant 1.000000e+00 : f32
    %37 = vector.broadcast %cst_22 : f32 to vector<32x1xf32>
    %38 = arith.addf %37, %36 : vector<32x1xf32>
    %39 = arith.divf %37, %38 : vector<32x1xf32>
    %c0_i32_23 = arith.constant 0 : i32
    %c2_i32_24 = arith.constant 2 : i32
    %40 = arith.addi %c0_i32_23, %c2_i32_24 : i32
    %c1_i32_25 = arith.constant 1 : i32
    scf.for %arg5 = %c0_i32_23 to %40 step %c1_i32_25  : i32 {
      %c1_i32_27 = arith.constant 1 : i32
      %41 = arith.muli %arg5, %c1_i32_27 : i32
      %c0_i32_28 = arith.constant 0 : i32
      %42 = arith.addi %c0_i32_28, %41 : i32
      %c128_i32_29 = arith.constant 128 : i32
      %43 = arith.muli %42, %c128_i32_29 : i32
      %44 = tpu.assume_multiple %43, 128 : i32
      %c0_30 = arith.constant 0 : index
      %c0_31 = arith.constant 0 : index
      %45 = arith.index_cast %44 : i32 to index
      %46 = vector.load %arg1[%c0_30, %c0_31, %45] : memref<1x32x256xf32, #tpu.memory_space<vmem>>, vector<1x32x128xf32>
      %47 = vector.shape_cast %46 : vector<1x32x128xf32> to vector<32x128xf32>
      %48 = vector.broadcast %39 : vector<32x1xf32> to vector<32x128xf32>
      %49 = arith.mulf %47, %48 : vector<32x128xf32>
      %c0_32 = arith.constant 0 : index
      %c0_33 = arith.constant 0 : index
      %50 = arith.index_cast %44 : i32 to index
      %51 = vector.load %arg4[%c0_32, %c0_33, %50] : memref<1x32x256xf32, #tpu.memory_space<vmem>>, vector<1x32x128xf32>
      %52 = vector.shape_cast %51 : vector<1x32x128xf32> to vector<32x128xf32>
      %53 = vector.shape_cast %49 : vector<32x128xf32> to vector<1x32x128xf32>
      tpu.vector_store %arg4[%c0_32, %c0_33, %50], %53 {strides = array<i32>} : memref<1x32x256xf32, #tpu.memory_space<vmem>>, vector<1x32x128xf32>,
    }
    %c2_i32_26 = arith.constant 2 : i32
    return
  }
  func.func @transform_0(%arg0: i32) -> (i32, i32, i32) {
    %c0_i32 = arith.constant 0 : i32
    %c0_i32_0 = arith.constant 0 : i32
    %c0_i32_1 = arith.constant 0 : i32
    return %arg0, %c0_i32, %c0_i32_0 : i32, i32, i32
  }
  func.func @transform_1(%arg0: i32) -> (i32, i32) {
    %c0_i32 = arith.constant 0 : i32
    %c0_i32_0 = arith.constant 0 : i32
    %c0_i32_1 = arith.constant 0 : i32
    return %c0_i32, %c0_i32_0 : i32, i32
  }
  func.func @transform_2(%arg0: i32) -> (i32, i32) {
    %c0_i32 = arith.constant 0 : i32
    %c0_i32_0 = arith.constant 0 : i32
    %c0_i32_1 = arith.constant 0 : i32
    return %c0_i32, %c0_i32_0 : i32, i32
  }
  func.func @transform_3(%arg0: i32) -> (i32, i32, i32) {
    %c0_i32 = arith.constant 0 : i32
    %c0_i32_0 = arith.constant 0 : i32
    %c0_i32_1 = arith.constant 0 : i32
    return %arg0, %c0_i32, %c0_i32_0 : i32, i32, i32
  }
}

</mosaic_0001>

<bundles_post_ra>
// kernel: tpu_custom_call.1
= control target key start
LH: loop header
LB: loop body
LE: loop exit
PB: predicated region body
PF: predicated region fallthrough
CT: control target
= control target key end

     0   :  { %8 = vsyncpa [#allocation3], 0  ;;  %s1280_s0 = inlined_call_operand.hbm [shape: f32[2,32,256], index: 0, kind: input, shape index: {}]   ;;  %s1281_s1 = inlined_call_operand.vmem [shape: f32[2,32], index: 1, kind: input, shape index: {}]   ;;  %s1282_s2 = inlined_call_operand.vmem [shape: f32[32,2], index: 2, kind: input, shape index: {}]   ;;  %s1283_s3 = inlined_call_operand.hbm [shape: f32[2,32,256], index: 3, kind: output, shape index: {}]  }
   0x1   :  { %10 = vsyncpa [#allocation3 + $0x1], 0 }
   0x2   :  { %11 = vsyncpa [#allocation4], 0 }
   0x3   :  { %13 = vsyncpa [#allocation4 + $0x1], 0  ;;  %s1065_s12 = smov 0   ;;  %s1067_s13 = smov 0  }
   0x4   :  { %s1069_s14 = smov 0   ;;  %s1071_s15 = smov 0  }
   0x5 LB: > { %s1086_s16 = sadd.s32 4294967295, %s1029_s15   ;;  %s736_s17 = sadd.s32 4294967294, %s1029_s15   ;;  %s1029_s15 = sphi %s1071_s15, %s1296_s15   ;;  %s1025_s14 = sphi %s1069_s14, %s1295_s14   ;;  %s1021_s13 = sphi %s1067_s13, %s1294_s13   ;;  %s1017_s12 = sphi %s1065_s12, %s1293_s12  }
   0x6   : > { %s1090_s18 = sadd.s32 1, %s1029_s15   ;;  %s26_s19 = sadd.s32 1, %s1025_s14 }
   0x7   : > { %s23_s20 = ssub.s32 %s1029_s15, %s1090_s18  ;;  %p33_p0 = scmp.ne.s32.totalorder %s1025_s14, %s1021_s13 }
   0x8   : > { %p24_p1 = scmp.eq.s32.totalorder %s23_s20, 0  ;;  %p34_p2 = scmp.eq.s32.totalorder %s1029_s15, 0 }
   0x9   : > { %p39_p3 = scmp.ne.s32.totalorder %s1021_s13, %s1017_s12  ;;  %p40_p4 = scmp.eq.s32.totalorder %s1086_s16, 0 }
   0xa   : > { %s1102_s21 = scalar_select %p24_p1, %s1025_s14, %s26_s19  }
   0xb   : > { %p1104_p5 = por %p34_p2, %p33_p0  ;;  %p1108_p6 = por %p40_p4, %p39_p3 }
   0xc   : > { %p105_p7 = scmp.eq.s32.totalorder %s1086_s16, 1  ;;  %p111_p8 = scmp.eq.s32.totalorder %s736_s17, 1 }
   0xd   : > { %p861_p10 = scmp.lt.s32.totalorder %s1029_s15, 2  ;;  %s137_s26 = sand.u32 1, %s1025_s14  }
   0xe   : > { %p1115_p11 = por %p105_p7, %p33_p0  ;;  %p1119_p12 = por %p111_p8, %p39_p3 }
   0xf   : > { %s773_s27 = sshll.u32 %s1029_s15, 10  ;;  %s739_s28 = sshll.u32 %s137_s26, 6 }
  0x10   : > { %s1287_s24 = scalar_select %p1115_p11, 1, 0 }
  0x11   : > { %s1288_s25 = scalar_select %p1119_p12, 1, 0 }
  0x12   : > { %s1128_s4 = scalar_lea.hbm %s1280_s0, %s773_s27  ;;  %s141_s5 = scalar_lea.vmem [#allocation2], %s739_s28 }
  0x13   : > { %s148_s6 = sshll.u32 %s141_s5, 4  ;;  %p1132_p13 = pnand %p861_p10, %p1104_p5  ;;  %s1136_s6 = int_to_ptr.vmem [resolvable:$true] %s148_s6 }
  0x14   : > { %s1138_s8 = scalar_lea.sflag [#allocation3], %s137_s26  ;;  %s929_s9 = scalar_lea.hbm %s1128_s4, 1024 }
  0x15   : > { %p930_p0 = scmp.ne.s32.totalorder %s1128_s4, %s929_s9  ;;  %p931_p1 = pneg %p1132_p13 }
  0x16   : > { %s934_s17 = scalar_lea.hbm %s1280_s0, 2048  ;;  %p935_p4 = scmp.lt.u32.totalorder %s1128_s4, %s1280_s0 }
  0x17   : > { %p932_p2 = pnand %p931_p1, %p930_p0  ;;  %p936_p5 = scmp.lt.u32.totalorder %s934_s17, %s929_s9 }
  0x18   : > { %p938_p8 = scmp.lt.u32.totalorder %s929_s9, %s1128_s4 }
  0x19   : > { %p933_p3 = pneg %p932_p2  ;;  %p937_p7 = por %p936_p5, %p935_p4 }
  0x1b   : > { %p939_p10 = por %p938_p8, %p937_p7 }
  0x1d   : > { %p940_p9 = pnand %p939_p10, %p933_p3 }
  0x1f   : > { %943 = shalt.err (!%p940_p9)
}
  0x20   : > { %s944_s22 = scalar_lea.vmem %s1136_s6, 1024  ;;  %s1035_s26 = smov [#allocation2]  }
  0x21   : > { %p945_p0 = scmp.ne.s32.totalorder %s1136_s6, %s944_s22  ;;  %s949_s27 = sshll.u32 %s1035_s26, 4  ;;  %s950_s27 = int_to_ptr.vmem [resolvable:$false] %s949_s27 }
  0x22   : > { %s951_s28 = scalar_lea.vmem %s950_s27, 2048  ;;  %p952_p11 = scmp.lt.s32.totalorder %s1136_s6, %s950_s27 }
  0x23   : > { %p947_p2 = pnand %p945_p0, %p931_p1  ;;  %p953_p4 = scmp.lt.s32.totalorder %s951_s28, %s944_s22 }
  0x25   : > { %p948_p12 = pneg %p947_p2  ;;  %p954_p5 = por %p953_p4, %p952_p11 }
  0x27   : > { %p955_p7 = pnand %p954_p5, %p948_p12 }
  0x29   : > { %958 = shalt.err (!%p955_p7)
}
  0x2a   : > { %s1036_s29 = smov 256   ;;  %s1037_s30 = smov 16  }
  0x2b   : > { %856 = dma.hbm_to_vmem [thread:$0]  (!%p1132_p13), %s1128_s4, 1024, %s1136_s6, %s1138_s8, %s1036_s29, %s1036_s29, %s1037_s30  }
  0x2c   : > { %p742_p9 = scmp.ge.s32.totalorder %s1029_s15, 1  ;;  %p156_p1 = scmp.lt.s32.totalorder %s1029_s15, 3 }
  0x2e   : > { %p157_p3 = pnand %p742_p9, %p156_p1 }
  0x2f   : > { %s1169_s5 = sand.u32 (!%p157_p3), 1, %s1021_s13  }
  0x30   : > { %160 = sbr.rel (%p157_p3) target bundleno = 843 (0x34b), region = 32  ;;  %s743_s9 = sshll.u32 (!%p157_p3), %s1169_s5, 6 }
  0x31   : > { %s163_s10 = scalar_lea.sflag (!%p157_p3), [#allocation3], %s1169_s5  ;;  %s1175_s11 = scalar_lea.vmem (!%p157_p3), [#allocation2], %s743_s9 }
  0x37   : > { %1008 = dma.done.wait (%p1108_p6), %s163_s10, 1024  }
  0x38   : > { %1010 = vsyncadd (%p1108_p6), %s163_s10, 4294966272  ;;  %v191_v0 = vld [vmem:[%s1175_s11 + $0x20] sm:$0xff]  ;;  %v747_v1 = vld [vmem:[%s1175_s11 + $0x28] sm:$0xff]  ;;  %v1038_v16 = vmov 0.0|0.0   ;;  %vm1039_vm0 = vmmov 0   ;;  %v1040_v17 = vmov 0.0  }
  0x39   : > { %v189_v2 = vld [vmem:[%s1175_s11] sm:$0xff]  ;;  %v204_v3 = vadd.f32 %v747_v1, %v191_v0  ;;  %v745_v4 = vld [vmem:[%s1175_s11 + $0x8] sm:$0xff]  ;;  %v192_v5 = vld [vmem:[%s1175_s11 + $0x30] sm:$0xff]  ;;  %v208_v15 = vmax.f32 %v191_v0, %v747_v1  ;;  %833 = vmatprep.subr.bf16.mxu1 %v1038_v16  ;;  %803 = vmatprep.mubr.msk.f32.mxu1 %vm1039_vm0, %v1040_v17  ;;  %vm231_vm1 = vcmask 261120   ;;  %vm381_vm2 = vcmask 15360   ;;  %s1216_s27 = scalar_lea.vmem [#allocation5], %s743_s9 }
  0x3a   : > { %v748_v6 = vld [vmem:[%s1175_s11 + $0x38] sm:$0xff]  ;;  %v202_v7 = vadd.f32 %v745_v4, %v189_v2  ;;  %v190_v8 = vld [vmem:[%s1175_s11 + $0x10] sm:$0xff]  ;;  %v206_v13 = vmax.f32 %v189_v2, %v745_v4  ;;  %v230_v31 = vld [vmem:[%s1281_s1] sm:$0x3]  ;;  %vm394_vm3 = vcmask 1041408   ;;  %s1218_s28 = smov 0  }
  0x3b   : > { %v746_v9 = vld [vmem:[%s1175_s11 + $0x18] sm:$0xff]  ;;  %214 = vadd.xlane.f32.xlu1 %v204_v3  ;;  %v205_v10 = vadd.f32 %v748_v6, %v192_v5  ;;  %v209_v14 = vmax.f32 %v192_v5, %v748_v6  ;;  %v377_v35 = vld [vmem:[%s1282_s2] sm:$0xff]  ;;  %v378_v41 = vld [vmem:[%s1282_s2 + $0x8] sm:$0xff] }
  0x3c   : > { %210 = vadd.xlane.f32.xlu0 %v202_v7  ;;  %v203_v11 = vadd.f32 %v746_v9, %v190_v8  ;;  %v207_v12 = vmax.f32 %v190_v8, %v746_v9  ;;  %819 = vmatprep.mubr.msk.f32.mxu0 %vm381_vm2, %v377_v35  ;;  %v379_v43 = vld [vmem:[%s1282_s2 + $0x10] sm:$0xff]  ;;  %v380_v44 = vld [vmem:[%s1282_s2 + $0x18] sm:$0xff] }
  0x3f   : > { %216 = vadd.xlane.f32.xlu1 %v205_v10 }
  0x40   : > { %212 = vadd.xlane.f32.xlu0 %v203_v11 }
  0x43   : > { %220 = vmax.xlane.f32.xlu1 %v207_v12 }
  0x44   : > { %218 = vmax.xlane.f32.xlu0 %v206_v13 }
  0x47   : > { %224 = vmax.xlane.f32.xlu1 %v209_v14 }
  0x48   : > { %222 = vmax.xlane.f32.xlu0 %v208_v15 }
  0xc8   : > { %v215_v18 = vpop.xlane.xlu1 %214 }
  0xc9   : > { %v211_v19 = vpop.xlane.xlu0 %210  ;;  %v228_v24 = vmul.f32 0.00390625, %v215_v18 }
  0xca   : > { %v226_v22 = vmul.f32 0.00390625, %v211_v19 }
  0xcc   : > { %v217_v20 = vpop.xlane.xlu1 %216 }
  0xcd   : > { %v213_v21 = vpop.xlane.xlu0 %212  ;;  %v229_v25 = vmul.f32 0.00390625, %v217_v20 }
  0xce   : > { %v227_v23 = vmul.f32 0.00390625, %v213_v21 }
  0xcf   : > { %v837_v29 = vpack.c.bf16 %v229_v25, %v228_v24 }
  0xd0   : > { %v834_v26 = vpack.c.bf16 %v227_v23, %v226_v22  ;;  %v221_v27 = vpop.xlane.xlu1 %220 }
  0xd1   : > { %v219_v28 = vpop.xlane.xlu0 %218 }
  0xd2   : > { %835 = vmatpush3.bf16.msra.mxu1 %v834_v26  ;;  %v840_v30 = vpack.c.bf16 %v221_v27, %v219_v28 }
  0xd3   : > { %836 = vmatprep.subr.bf16.mxu1 %v1038_v16 }
  0xd4   : > { %v225_v32 = vpop.xlane.xlu1 %224 }
  0xd5   : > { %v223_v33 = vpop.xlane.xlu0 %222 }
  0xd6   : > { %838 = vmatpush3.bf16.msra.mxu1 %v837_v29  ;;  %v843_v34 = vpack.c.bf16 %v225_v32, %v223_v33 }
  0xd7   : > { %839 = vmatprep.subr.bf16.mxu1 %v1038_v16 }
  0xd9   : > { %804 = vmatmul.mubr.msk.f32.vlgmr.msra.gmra.mrb[0].mxu1 %vm231_vm1, %v230_v31 }
  0xda   : > { %841 = vmatpush3.bf16.msra.mxu1 %v840_v30  ;;  %814 = vmatprep.mubr.msk.f32.mxu1 %vm1039_vm0, %v1040_v17 }
  0xdb   : > { %842 = vmatprep.subr.bf16.mxu1 %v1038_v16 }
  0xde   : > { %844 = vmatpush3.bf16.msra.mxu1 %v843_v34 }
  0xe1   : > { %815 = vmatmul.mubr.msk.f32.vlgmr.msra.gmra.mrb[2].mxu1 %vm231_vm1, %v230_v31 }
 0x1ac   : > { %v301_v36 = vpop.f32.mrb[0].mxu1 }
 0x1ad   : > { %v805_v37 = vpop.f32.mrb[1].mxu1  ;;  %v305_v42 = vmax.f32 %v301_v36, 0.0 }
 0x1b4   : > { %v372_v38 = vpop.f32.mrb[2].mxu1 }
 0x1b5   : > { %v376_v39 = vmax.f32 %v372_v38, 0.0  ;;  %v816_v40 = vpop.f32.mrb[3].mxu1 }
 0x1b7   : > { %817 = vmatprep.subr.msk.mxu0 %vm394_vm3, %v376_v39 }
 0x1b8   : > { %818 = vmatpush3.msk.msra.mxu0 %vm394_vm3, %v376_v39 }
 0x1b9   : > { %820 = vmatmul.mubr.msk.f32.vlgmr.msra.gmra.mrb[0].mxu0 %vm381_vm2, %v378_v41  ;;  %825 = vmatprep.subr.msk.mxu0 %vm394_vm3, %v305_v42 }
 0x1ba   : > { %826 = vmatpush3.msk.msra.mxu0 %vm394_vm3, %v305_v42  ;;  %822 = vmatprep.mubr.msk.f32.mxu0 %vm381_vm2, %v379_v43 }
 0x1bd   : > { %823 = vmatmul.mubr.msk.f32.gmra.mrb[2].mxu0 %vm381_vm2, %v380_v44 }
 0x1be   : > { %827 = vmatprep.mubr.msk.f32.mxu0 %vm381_vm2, %v377_v35 }
 0x1c1   : > { %828 = vmatmul.mubr.msk.f32.vlgmr.msra.gmra.mrb[0].mxu0 %vm381_vm2, %v378_v41 }
 0x1c2   : > { %830 = vmatprep.mubr.msk.f32.mxu0 %vm381_vm2, %v379_v43 }
 0x1c5   : > { %831 = vmatmul.mubr.msk.f32.gmra.mrb[2].mxu0 %vm381_vm2, %v380_v44 }
 0x294   : > { %v829_v45 = vpop.f32.mrb[0].mxu0 }
 0x295   : > { %v762_v46 = vmul.f32 -1.442695, %v829_v45  ;;  %v552_v47 = vpop.f32.mrb[1].mxu0 }
 0x296   : > { %v761_v48 = vmul.f32 -1.442695, %v552_v47 }
 0x297   : > { %911 = vpow2.f32 %v762_v46 }
 0x298   : > { %913 = vpow2.f32 %v761_v48  ;;  %v832_v49 = vpop.f32.mrb[2].mxu0 }
 0x299   : > { %v764_v50 = vmul.f32 -1.442695, %v832_v49  ;;  %v562_v51 = vpop.f32.mrb[3].mxu0 }
 0x29a   : > { %v763_v52 = vmul.f32 -1.442695, %v562_v51 }
 0x29b   : > { %915 = vpow2.f32 %v764_v50 }
 0x29c   : > { %917 = vpow2.f32 %v763_v52 }
 0x2a1   : > { %v912_v53 = vpop.eup %911 }
 0x2a2   : > { %v914_v54 = vpop.eup %913  ;;  %v584_v55 = vadd.f32 1.0, %v912_v53 }
 0x2a3   : > { %v583_v56 = vadd.f32 1.0, %v914_v54 }
 0x2a4   : > { %919 = vrcp.f32 %v584_v55 }
 0x2a5   : > { %v916_v57 = vpop.eup %915  ;;  %921 = vrcp.f32 %v583_v56 }
 0x2a6   : > { %v918_v58 = vpop.eup %917  ;;  %v586_v59 = vadd.f32 1.0, %v916_v57 }
 0x2a7   : > { %v585_v60 = vadd.f32 1.0, %v918_v58 }
 0x2a8   : > { %923 = vrcp.f32 %v586_v59 }
 0x2a9   : > { %925 = vrcp.f32 %v585_v60 }
 0x2ae   : > { %v920_v61 = vpop.eup %919 }
 0x2af   : > { %v922_v62 = vpop.eup %921 }
 0x2b2   : > { %v924_v63 = vpop.eup %923 }
 0x2b3   : > { %v926_v0 = vpop.eup %925 }
 0x2b4 LB: >> { %v1041_v1 = vmov 0   ;;  %s765_s29 = sshll.u32 %s1033_s28, 7  ;;  %s600_s28 = sadd.s32 1, %s1033_s28   ;;  %s1033_s28 = sphi %s1218_s28, %s600_s28  }
 0x2b5   : >> { %928 = vset.pattern.permute.xlu1 %v1041_v1  ;;  %927 = vset.pattern.permute.xlu0 %v1041_v1  ;;  %s602_s30 = sshra.s32 %s765_s29, 7  ;;  %p597_p6 = scmp.ge.s32.totalorder %s600_s28, 2  }
 0x2b6   : >> { %622 = vperm.xlu1 %928, %v926_v0   ;;  %612 = vperm.xlu0 %927, %v922_v62   ;;  %s766_s9 = sshll.u32 %s602_s30, 3  ;;  %s774_s4 = sshll.u32 (%p597_p6), %s1086_s16, 10 }
 0x2b7   : >> { %s605_s10 = scalar_lea.vmem %s1175_s11, %s766_s9 [#allocation2]  ;;  %s635_s23 = scalar_lea.vmem %s1216_s27, %s766_s9 [#allocation5] }
 0x2b8   : >> { %v608_v2 = vld [vmem:[%s605_s10 + $0x20] sm:$0xff]  ;;  %v609_v8 = vld [vmem:[%s605_s10 + $0x30] sm:$0xff]  ;;  %s1233_s8 = scalar_lea.hbm (%p597_p6), %s1283_s3, %s774_s4  ;;  %s654_s17 = sshll.u32 (%p597_p6), %s1216_s27, 4  ;;  %s1236_s17 = int_to_ptr.vmem [resolvable:$true] %s654_s17 }
 0x2b9   : >> { %v606_v3 = vld [vmem:[%s605_s10] sm:$0xff]  ;;  %v607_v9 = vld [vmem:[%s605_s10 + $0x10] sm:$0xff]  ;;  %s641_s19 = scalar_lea.sflag (%p597_p6), [#allocation4], %s1169_s5  ;;  %s959_s20 = scalar_lea.vmem (%p597_p6), %s1236_s17, 1024 }
 0x2ba   : >> { %627 = vperm.xlu1 %928, %v924_v63   ;;  %617 = vperm.xlu0 %927, %v920_v61   ;;  %p960_p11 = scmp.ne.s32.totalorder (%p597_p6), %s1236_s17, %s959_s20  ;;  %p1290_p12 = scmp.ne.s32.totalorder (%p597_p6), %s1287_s24, 0 }
 0x2bb   : > { %s1042_s11 = smov (%p597_p6), [#allocation5]  }
 0x2bc   : > { %p961_p13 = pnand (%p597_p6), %p960_p11, %p1290_p12  ;;  %s963_s22 = sshll.u32 (%p597_p6), %s1042_s11, 4  ;;  %s964_s22 = int_to_ptr.vmem [resolvable:$false] %s963_s22 }
 0x2bd   : > { %s965_s16 = scalar_lea.vmem (%p597_p6), %s964_s22, 2048  ;;  %p966_p10 = scmp.lt.s32.totalorder (%p597_p6), %s1236_s17, %s964_s22 }
 0x2be   : > { %p962_p8 = pneg (%p597_p6), %p961_p13  ;;  %p967_p0 = scmp.lt.s32.totalorder (%p597_p6), %s965_s16, %s959_s20 }
 0x2c0   : > { %p968_p2 = por (%p597_p6), %p967_p0, %p966_p10 }
 0x2c2   : > { %p969_p4 = pnand (%p597_p6), %p968_p2, %p962_p8 }
 0x335   : >> { %v623_v4 = vpop.permute.xlu1 %622  ;;  %v613_v5 = vpop.permute.xlu0 %612 }
 0x336   : >> { %v632_v6 = vmul.f32 %v623_v4, %v608_v2  ;;  %v630_v7 = vmul.f32 %v613_v5, %v606_v3  ;;  %599 = sbr.rel (!%p597_p6) target bundleno = 692 (0x2b4), region = 87 }
 0x338   : >> { %638 = vst [vmem:[%s635_s23 + $0x20] sm:$0xff] %v632_v6  ;;  %636 = vst [vmem:[%s635_s23] sm:$0xff] %v630_v7 }
 0x339   : >> { %v628_v10 = vpop.permute.xlu1 %627  ;;  %v618_v11 = vpop.permute.xlu0 %617 }
 0x33a   : >> { %v633_v12 = vmul.f32 %v628_v10, %v609_v8  ;;  %v631_v13 = vmul.f32 %v618_v11, %v607_v9 }
 0x33c   : >> { %639 = vst [vmem:[%s635_s23 + $0x30] sm:$0xff] %v633_v12  ;;  %637 = vst [vmem:[%s635_s23 + $0x10] sm:$0xff] %v631_v13 }
 0x33d   : > { %972 = shalt.err (!%p969_p4)
}
 0x33e   : > { %s973_s26 = scalar_lea.hbm %s1233_s8, 1024  ;;  %s977_s29 = scalar_lea.hbm %s1283_s3, 2048 }
 0x33f   : > { %p974_p5 = scmp.ne.s32.totalorder %s1233_s8, %s973_s26  ;;  %p978_p1 = scmp.lt.u32.totalorder %s1233_s8, %s1283_s3 }
 0x340   : > { %p979_p3 = scmp.lt.u32.totalorder %s977_s29, %s973_s26  ;;  %p981_p11 = scmp.lt.u32.totalorder %s973_s26, %s1233_s8 }
 0x341   : > { %p975_p7 = pnand %p974_p5, %p1290_p12 }
 0x342   : > { %p980_p6 = por %p979_p3, %p978_p1 }
 0x343   : > { %p976_p9 = pneg %p975_p7 }
 0x344   : > { %p982_p13 = por %p981_p11, %p980_p6 }
 0x346   : > { %p983_p8 = pnand %p982_p13, %p976_p9 }
 0x348   : > { %986 = shalt.err (!%p983_p8)
}
 0x349   : > { %s1043_s10 = smov 256   ;;  %s1044_s23 = smov 16  }
 0x34a   : > { %851 = dma.vmem_to_hbm [thread:$0]  (%p1290_p12), %s1236_s17, 1024, %s1233_s8, %s641_s19, %s1043_s10, %s1043_s10, %s1044_s23  }
 0x34b PF: > { %s669_s4 = sand.u32 1, %s1017_s12   ;;  %p1291_p10 = scmp.ne.s32.totalorder %s1288_s25, 0 }
 0x34c   : > { %p1292_p0 = scmp.ge.s32.totalorder %s1029_s15, 2  ;;  %s670_s6 = scalar_lea.sflag [#allocation4], %s669_s4 }
 0x34e   : > { %p858_p2 = pnand %p1292_p0, %p1291_p10 }
 0x350   : > { %1012 = dma.done.wait (!%p858_p2), %s670_s6, 1024  }
 0x351   : > { %1014 = vsyncadd (!%p858_p2), %s670_s6, 4294966272  ;;  %p16_p4 = scmp.ge.s32.totalorder %s1090_s18, 4   ;;  %s1293_s12 = smov %s1021_s13 }
 0x352   : > { %s1294_s13 = smov %s1025_s14  ;;  %s1295_s14 = smov %s1102_s21 }
 0x353   : > { %s1296_s15 = smov %s1090_s18  ;;  %18 = sbr.rel (!%p16_p4) target bundleno = 5 (0x5), region = 98 }
 0x35a   :  { %675 = vsyncpa [#allocation3], 1 }
 0x35b   :  { %677 = vsyncpa [#allocation3 + $0x1], 1 }
 0x35c   :  { %678 = vsyncpa [#allocation4], 1 }
 0x35d   :  { %680 = vsyncpa [#allocation4 + $0x1], 1 }

</bundles_post_ra>
